<compile_context>
chip_gen: v5e
topology: v5e:2x2
jax: 0.10.0
libtpu: 0.0.40
codegen_flags: <defaults>
</compile_context>

<pallas_src>
import functools

import jax
import jax.numpy as jnp
from jax import lax
from jax.experimental import pallas as pl
from jax.experimental.pallas import tpu as pltpu


# ---------------------------------------------------------------------------
# Kernel body
# ---------------------------------------------------------------------------
def _gvp_layernorm_kernel(s_ref, v_ref, w_ref, b_ref, s_out_ref, v_out_ref,
                          *, ln_eps, v_eps):
    # Layouts (node axis N is the lane dimension everywhere):
    #   s_ref       : (S, TN)     scalar channels x nodes
    #   v_ref       : (3, V, TN)  spatial component x vector channels x nodes
    #   w_ref/b_ref : (S, 1)      LayerNorm affine params
    # All reductions are over sublane axes (channels), never over lanes
    # (nodes): the ragged last tile's out-of-bounds lanes cannot contaminate
    # valid nodes, and their writes are masked off by Pallas.

    # ---- scalar channels: LayerNorm over S (sublane axis) ----
    s = s_ref[...].astype(jnp.float32)                          # (S, TN)
    mean = jnp.mean(s, axis=0, keepdims=True)                   # (1, TN)
    centered = s - mean
    var = jnp.mean(centered * centered, axis=0, keepdims=True)  # biased var
    inv_std = lax.rsqrt(var + ln_eps)                           # EUP slot
    w = w_ref[...].astype(jnp.float32)                          # (S, 1)
    b = b_ref[...].astype(jnp.float32)
    # NOTE: the (S, 1) -> (S, TN) lane splat of w/b is a handful of vreg ops
    # per tile; pre-broadcasting them to (S, TN) would spend VMEM better used
    # on a larger node tile in this HBM-bound kernel, so we keep (S, 1).
    s_out_ref[...] = (centered * inv_std * w + b).astype(s_out_ref.dtype)

    # ---- vector channels: per-node RMS over (V, 3) with per-(V) clamp ----
    v = v_ref[...].astype(jnp.float32)                          # (3, V, TN)
    # Sum over the 3 spatial components = element-wise VPU adds (no XLU).
    sq = v[0] * v[0] + v[1] * v[1] + v[2] * v[2]                # (V, TN)
    sq = jnp.maximum(sq, v_eps)                                 # clamp(min=eps)
    inv_vn = lax.rsqrt(jnp.mean(sq, axis=0, keepdims=True))     # (1, TN), EUP
    v_out_ref[...] = (v * inv_vn[None]).astype(v_out_ref.dtype)


# ---------------------------------------------------------------------------
# Tile sizing
# ---------------------------------------------------------------------------
def _round_up(x, m):
    return (x + m - 1) // m * m


@functools.lru_cache(maxsize=None)
def _vmem_budget_bytes():
    """Generation-aware (scoped VMEM limit, tile budget) in bytes."""
    try:
        cap = int(pltpu.get_tpu_info().vmem_capacity_bytes)
    except Exception:
        cap = 64 * 1024 * 1024          # conservative fallback (v7x per-core)
    limit = min(cap // 2, 96 * 1024 * 1024)
    return limit, (limit * 3) // 4


def _pick_node_tile(N, S, V, itemsize, node_tile, budget):
    def tile_bytes(t):
        s_blk = _round_up(S, 8) * t
        v_blk = 3 * _round_up(V, 8) * t
        io = 2 * 2 * (s_blk + v_blk) * itemsize     # double-buffered in + out
        work = 3 * (s_blk + v_blk) * 4              # f32 temporaries headroom
        params = 4 * _round_up(S, 8) * 128 * 4      # w/b blocks (const index)
        return io + work + params

    tn = max(128, _round_up(min(node_tile, max(N, 1)), 128))
    if N > 128:
        # Guarantee >= 2 grid steps so ("parallel",) can shard nodes across
        # both TensorCores on v7x (a single-step grid serializes on one TC).
        tn = min(tn, max(128, _round_up((N + 1) // 2, 128)))
    while tn > 128 and tile_bytes(tn) > budget:
        tn -= 128
    return tn


# ---------------------------------------------------------------------------
# Lane-dense entry point (preferred: carry this layout between layers)
# ---------------------------------------------------------------------------
def gvp_layer_norm_lane_dense(s_t, v_t, weight, bias, *, ln_eps=1e-5,
                              v_eps=1e-8, node_tile=8192):
    """Core kernel call on the node-last (lane-dense) layout.

    s_t: (S, N), v_t: (3, V, N), weight/bias: (S,).  Returns (s_out_t,
    v_out_t) in the same layout.  A model that keeps this layout between
    layers pays no transpose / pad HBM traffic around this op at all.
    """
    S, N = s_t.shape
    C, V, Nv = v_t.shape
    assert C == 3 and Nv == N and N >= 1

    itemsize = max(jnp.dtype(s_t.dtype).itemsize, jnp.dtype(v_t.dtype).itemsize)
    vmem_limit, budget = _vmem_budget_bytes()
    tn = _pick_node_tile(N, S, V, itemsize, node_tile, budget)
    grid = (pl.cdiv(N, tn),)            # ragged last tile handled by Pallas

    w2 = weight.reshape(S, 1)
    b2 = bias.reshape(S, 1)

    kernel = functools.partial(_gvp_layernorm_kernel, ln_eps=ln_eps, v_eps=v_eps)

    # Second-order knob (not applied): pipeline_mode=pl.Buffered(3) on the
    # s / v specs if profiling still shows exposed DMA at step boundaries.
    return pl.pallas_call(
        kernel,
        out_shape=(
            jax.ShapeDtypeStruct((S, N), s_t.dtype),
            jax.ShapeDtypeStruct((3, V, N), v_t.dtype),
        ),
        grid=grid,
        in_specs=[
            pl.BlockSpec((S, tn), lambda i: (0, i)),
            pl.BlockSpec((3, V, tn), lambda i: (0, 0, i)),
            pl.BlockSpec((S, 1), lambda i: (0, 0)),
            pl.BlockSpec((S, 1), lambda i: (0, 0)),
        ],
        out_specs=(
            pl.BlockSpec((S, tn), lambda i: (0, i)),
            pl.BlockSpec((3, V, tn), lambda i: (0, 0, i)),
        ),
        compiler_params=pltpu.CompilerParams(
            dimension_semantics=("parallel",),   # shard nodes across TCs (v7x)
            vmem_limit_bytes=vmem_limit,
        ),
    )(s_t, v_t, w2, b2)


# ---------------------------------------------------------------------------
# Natural-layout wrapper (PyTorch interface parity; layout plumbing only)
# ---------------------------------------------------------------------------
def gvp_layer_norm(s, v, weight, bias, **kwargs):
    """(N, S), (N, V, 3) in and out, matching the PyTorch module.

    The transposes below are pure layout plumbing kept for interface parity /
    testing; in a real model keep the lane-dense layout between layers and
    call gvp_layer_norm_lane_dense directly to avoid these HBM round trips.
    """
    N, S = s.shape
    Nv, V, C = v.shape
    assert N == Nv and C == 3
    s_out_t, v_out_t = gvp_layer_norm_lane_dense(
        s.T, jnp.transpose(v, (2, 1, 0)), weight, bias, **kwargs)
    return s_out_t.T, jnp.transpose(v_out_t, (2, 1, 0))


# ---------------------------------------------------------------------------
# Pure-JAX reference and self-test
# ---------------------------------------------------------------------------
def _reference(s, v, weight, bias, ln_eps=1e-5, v_eps=1e-8):
    mean = jnp.mean(s, axis=-1, keepdims=True)
    var = jnp.mean((s - mean) ** 2, axis=-1, keepdims=True)
    s_out = (s - mean) / jnp.sqrt(var + ln_eps) * weight + bias
    vn = jnp.maximum(jnp.sum(v * v, axis=-1, keepdims=True), v_eps)
    vn = jnp.sqrt(jnp.mean(vn, axis=-2, keepdims=True))
    return s_out, v / vn


if __name__ == "__main__":
    key = jax.random.PRNGKey(0)
    k_s, k_v, k_w, k_b = jax.random.split(key, 4)

    # Small shapes; N deliberately not a multiple of 128 so the ragged last
    # tile (masked by Pallas, no wrapper-side pad) and a 2-step grid are both
    # exercised.
    N, S, V = 300, 32, 4
    s = jax.random.normal(k_s, (N, S), dtype=jnp.float32)
    v = jax.random.normal(k_v, (N, V, 3), dtype=jnp.float32)

    # Deterministic synthetic LayerNorm affine params (shapes of nn.LayerNorm(S)).
    weight = 1.0 + 0.1 * jax.random.normal(k_w, (S,), dtype=jnp.float32)
    bias = 0.05 * jax.random.normal(k_b, (S,), dtype=jnp.float32)

    run = jax.jit(gvp_layer_norm)
    s_out, v_out = run(s, v, weight, bias)
    jax.block_until_ready((s_out, v_out))

    s_ref, v_ref = _reference(s, v, weight, bias)
    assert s_out.shape == s_ref.shape and v_out.shape == v_ref.shape
    assert jnp.allclose(s_out, s_ref, atol=1e-5, rtol=1e-5)
    assert jnp.allclose(v_out, v_ref, atol=1e-5, rtol=1e-5)

    # Edge case: N < 128 -> single fully-ragged tile.
    s2, v2 = s[:77], v[:77]
    s_out2, v_out2 = jax.jit(gvp_layer_norm)(s2, v2, weight, bias)
    jax.block_until_ready((s_out2, v_out2))
    s_ref2, v_ref2 = _reference(s2, v2, weight, bias)
    assert jnp.allclose(s_out2, s_ref2, atol=1e-5, rtol=1e-5)
    assert jnp.allclose(v_out2, v_ref2, atol=1e-5, rtol=1e-5)

    # bf16 I/O smoke test (halves HBM traffic; math stays f32 in-kernel).
    s_bf, v_bf = s.astype(jnp.bfloat16), v.astype(jnp.bfloat16)
    s_out_bf, v_out_bf = jax.jit(gvp_layer_norm)(s_bf, v_bf, weight, bias)
    jax.block_until_ready((s_out_bf, v_out_bf))
    s_ref_bf, v_ref_bf = _reference(s_bf.astype(jnp.float32),
                                    v_bf.astype(jnp.float32), weight, bias)
    assert s_out_bf.dtype == jnp.bfloat16 and v_out_bf.dtype == jnp.bfloat16
    assert jnp.allclose(s_out_bf.astype(jnp.float32), s_ref_bf, atol=3e-2, rtol=3e-2)
    assert jnp.allclose(v_out_bf.astype(jnp.float32), v_ref_bf, atol=3e-2, rtol=3e-2)

    print("KERNEL_OK")
</pallas_src>

<mosaic_0001>
module attributes {stable_mosaic.version = 11 : i64} {
  func.func @_gvp_layernorm_kernel(%arg0: i32, %arg1: memref<32x256xf32, #tpu.memory_space<vmem>>, %arg2: memref<3x4x256xf32, #tpu.memory_space<vmem>>, %arg3: memref<32x1xf32, #tpu.memory_space<vmem>>, %arg4: memref<32x1xf32, #tpu.memory_space<vmem>>, %arg5: memref<32x256xf32, #tpu.memory_space<vmem>>, %arg6: memref<3x4x256xf32, #tpu.memory_space<vmem>>) attributes {dimension_semantics = [#tpu.dimension_semantics<parallel>], iteration_bounds = array<i64: 2>, scalar_prefetch = 0 : i64, scratch_operands = 0 : i64, tpu.core_type = #tpu.core_type<tc>, window_params = [{transform_indices = @transform_0, window_bounds = array<i64: 32, 256>}, {transform_indices = @transform_1, window_bounds = array<i64: 3, 4, 256>}, {pipeline_mode = #tpu.pipeline_mode<synchronous>, transform_indices = @transform_2, window_bounds = array<i64: 32, 1>}, {pipeline_mode = #tpu.pipeline_mode<synchronous>, transform_indices = @transform_3, window_bounds = array<i64: 32, 1>}, {transform_indices = @transform_4, window_bounds = array<i64: 32, 256>}, {transform_indices = @transform_5, window_bounds = array<i64: 3, 4, 256>}]} {
    %c0 = arith.constant 0 : index
    %c0_0 = arith.constant 0 : index
    %0 = vector.load %arg1[%c0, %c0_0] : memref<32x256xf32, #tpu.memory_space<vmem>>, vector<32x256xf32>
    %cst = arith.constant dense<0.000000e+00> : vector<256xf32>
    %1 = vector.multi_reduction <add>, %0, %cst [0] : vector<32x256xf32> to vector<256xf32>
    %2 = vector.shape_cast %1 : vector<256xf32> to vector<1x256xf32>
    %cst_1 = arith.constant 3.200000e+01 : f32
    %3 = vector.broadcast %cst_1 : f32 to vector<1x256xf32>
    %4 = arith.divf %2, %3 : vector<1x256xf32>
    %5 = vector.broadcast %4 : vector<1x256xf32> to vector<32x256xf32>
    %6 = arith.subf %0, %5 : vector<32x256xf32>
    %7 = arith.mulf %6, %6 : vector<32x256xf32>
    %cst_2 = arith.constant dense<0.000000e+00> : vector<256xf32>
    %8 = vector.multi_reduction <add>, %7, %cst_2 [0] : vector<32x256xf32> to vector<256xf32>
    %9 = vector.shape_cast %8 : vector<256xf32> to vector<1x256xf32>
    %cst_3 = arith.constant 3.200000e+01 : f32
    %10 = vector.broadcast %cst_3 : f32 to vector<1x256xf32>
    %11 = arith.divf %9, %10 : vector<1x256xf32>
    %cst_4 = arith.constant 9.99999974E-6 : f32
    %12 = vector.broadcast %cst_4 : f32 to vector<1x256xf32>
    %13 = arith.addf %11, %12 : vector<1x256xf32>
    %14 = math.rsqrt %13 : vector<1x256xf32>
    %c0_5 = arith.constant 0 : index
    %c0_6 = arith.constant 0 : index
    %15 = vector.load %arg3[%c0_5, %c0_6] : memref<32x1xf32, #tpu.memory_space<vmem>>, vector<32x1xf32>
    %c0_7 = arith.constant 0 : index
    %c0_8 = arith.constant 0 : index
    %16 = vector.load %arg4[%c0_7, %c0_8] : memref<32x1xf32, #tpu.memory_space<vmem>>, vector<32x1xf32>
    %17 = vector.broadcast %14 : vector<1x256xf32> to vector<32x256xf32>
    %18 = arith.mulf %6, %17 : vector<32x256xf32>
    %19 = vector.broadcast %15 : vector<32x1xf32> to vector<32x256xf32>
    %20 = arith.mulf %18, %19 : vector<32x256xf32>
    %21 = vector.broadcast %16 : vector<32x1xf32> to vector<32x256xf32>
    %22 = arith.addf %20, %21 : vector<32x256xf32>
    %c0_9 = arith.constant 0 : index
    %c0_10 = arith.constant 0 : index
    %23 = vector.load %arg5[%c0_9, %c0_10] : memref<32x256xf32, #tpu.memory_space<vmem>>, vector<32x256xf32>
    tpu.vector_store %arg5[%c0_9, %c0_10], %22 {strides = array<i32>} : memref<32x256xf32, #tpu.memory_space<vmem>>, vector<32x256xf32>,
    %c0_11 = arith.constant 0 : index
    %c0_12 = arith.constant 0 : index
    %c0_13 = arith.constant 0 : index
    %24 = vector.load %arg2[%c0_11, %c0_12, %c0_13] : memref<3x4x256xf32, #tpu.memory_space<vmem>>, vector<3x4x256xf32>
    %25 = vector.extract_strided_slice %24 {offsets = [0, 0, 0], sizes = [1, 4, 256], strides = [1, 1, 1]} : vector<3x4x256xf32> to vector<1x4x256xf32>
    %26 = vector.shape_cast %25 : vector<1x4x256xf32> to vector<4x256xf32>
    %27 = vector.extract_strided_slice %24 {offsets = [0, 0, 0], sizes = [1, 4, 256], strides = [1, 1, 1]} : vector<3x4x256xf32> to vector<1x4x256xf32>
    %28 = vector.shape_cast %27 : vector<1x4x256xf32> to vector<4x256xf32>
    %29 = arith.mulf %26, %28 : vector<4x256xf32>
    %30 = vector.extract_strided_slice %24 {offsets = [1, 0, 0], sizes = [1, 4, 256], strides = [1, 1, 1]} : vector<3x4x256xf32> to vector<1x4x256xf32>
    %31 = vector.shape_cast %30 : vector<1x4x256xf32> to vector<4x256xf32>
    %32 = vector.extract_strided_slice %24 {offsets = [1, 0, 0], sizes = [1, 4, 256], strides = [1, 1, 1]} : vector<3x4x256xf32> to vector<1x4x256xf32>
    %33 = vector.shape_cast %32 : vector<1x4x256xf32> to vector<4x256xf32>
    %34 = arith.mulf %31, %33 : vector<4x256xf32>
    %35 = arith.addf %29, %34 : vector<4x256xf32>
    %36 = vector.extract_strided_slice %24 {offsets = [2, 0, 0], sizes = [1, 4, 256], strides = [1, 1, 1]} : vector<3x4x256xf32> to vector<1x4x256xf32>
    %37 = vector.shape_cast %36 : vector<1x4x256xf32> to vector<4x256xf32>
    %38 = vector.extract_strided_slice %24 {offsets = [2, 0, 0], sizes = [1, 4, 256], strides = [1, 1, 1]} : vector<3x4x256xf32> to vector<1x4x256xf32>
    %39 = vector.shape_cast %38 : vector<1x4x256xf32> to vector<4x256xf32>
    %40 = arith.mulf %37, %39 : vector<4x256xf32>
    %41 = arith.addf %35, %40 : vector<4x256xf32>
    %cst_14 = arith.constant 9.99999993E-9 : f32
    %42 = vector.broadcast %cst_14 : f32 to vector<4x256xf32>
    %43 = arith.maximumf %41, %42 : vector<4x256xf32>
    %cst_15 = arith.constant dense<0.000000e+00> : vector<256xf32>
    %44 = vector.multi_reduction <add>, %43, %cst_15 [0] : vector<4x256xf32> to vector<256xf32>
    %45 = vector.shape_cast %44 : vector<256xf32> to vector<1x256xf32>
    %cst_16 = arith.constant 4.000000e+00 : f32
    %46 = vector.broadcast %cst_16 : f32 to vector<1x256xf32>
    %47 = arith.divf %45, %46 : vector<1x256xf32>
    %48 = math.rsqrt %47 : vector<1x256xf32>
    %49 = vector.shape_cast %48 : vector<1x256xf32> to vector<1x1x256xf32>
    %50 = vector.broadcast %49 : vector<1x1x256xf32> to vector<3x4x256xf32>
    %51 = arith.mulf %24, %50 : vector<3x4x256xf32>
    %c0_17 = arith.constant 0 : index
    %c0_18 = arith.constant 0 : index
    %c0_19 = arith.constant 0 : index
    %52 = vector.load %arg6[%c0_17, %c0_18, %c0_19] : memref<3x4x256xf32, #tpu.memory_space<vmem>>, vector<3x4x256xf32>
    tpu.vector_store %arg6[%c0_17, %c0_18, %c0_19], %51 {strides = array<i32>} : memref<3x4x256xf32, #tpu.memory_space<vmem>>, vector<3x4x256xf32>,
    return
  }
  func.func @transform_0(%arg0: i32) -> (i32, i32) {
    %c0_i32 = arith.constant 0 : i32
    %c0_i32_0 = arith.constant 0 : i32
    return %c0_i32, %arg0 : i32, i32
  }
  func.func @transform_1(%arg0: i32) -> (i32, i32, i32) {
    %c0_i32 = arith.constant 0 : i32
    %c0_i32_0 = arith.constant 0 : i32
    %c0_i32_1 = arith.constant 0 : i32
    return %c0_i32, %c0_i32_0, %arg0 : i32, i32, i32
  }
  func.func @transform_2(%arg0: i32) -> (i32, i32) {
    %c0_i32 = arith.constant 0 : i32
    %c0_i32_0 = arith.constant 0 : i32
    %c0_i32_1 = arith.constant 0 : i32
    return %c0_i32, %c0_i32_0 : i32, i32
  }
  func.func @transform_3(%arg0: i32) -> (i32, i32) {
    %c0_i32 = arith.constant 0 : i32
    %c0_i32_0 = arith.constant 0 : i32
    %c0_i32_1 = arith.constant 0 : i32
    return %c0_i32, %c0_i32_0 : i32, i32
  }
  func.func @transform_4(%arg0: i32) -> (i32, i32) {
    %c0_i32 = arith.constant 0 : i32
    %c0_i32_0 = arith.constant 0 : i32
    return %c0_i32, %arg0 : i32, i32
  }
  func.func @transform_5(%arg0: i32) -> (i32, i32, i32) {
    %c0_i32 = arith.constant 0 : i32
    %c0_i32_0 = arith.constant 0 : i32
    %c0_i32_1 = arith.constant 0 : i32
    return %c0_i32, %c0_i32_0, %arg0 : i32, i32, i32
  }
}

</mosaic_0001>

<bundles_post_ra>
// kernel: gvp_layer_norm.1
= control target key start
LH: loop header
LB: loop body
LE: loop exit
PB: predicated region body
PF: predicated region fallthrough
CT: control target
= control target key end

     0   :  { %s2321_s0 = inlined_call_operand.hbm [shape: f32[32,300], index: 0, kind: input, shape index: {}]   ;;  %s2322_s1 = inlined_call_operand.vmem [shape: f32[3,4,300], index: 1, kind: input, shape index: {}]   ;;  %s2323_s2 = inlined_call_operand.vmem [shape: f32[32,1], index: 2, kind: input, shape index: {}]   ;;  %s2324_s3 = inlined_call_operand.vmem [shape: f32[32,1], index: 3, kind: input, shape index: {}]   ;;  %s2325_s4 = inlined_call_operand.hbm [shape: f32[32,300], index: 4, kind: output, shape index: {0}]   ;;  %s2326_s5 = inlined_call_operand.hbm [shape: f32[3,4,300], index: 5, kind: output, shape index: {1}]  }
   0x1   :  { %2330 = sst [smem:[#allocation14_spill]] %s2321_s0 }
   0x2   :  { %2331 = sst [smem:[#allocation15_spill]] %s2322_s1 }
   0x3   :  { %11 = vsyncpa [#allocation3], 0 }
   0x4   :  { %13 = vsyncpa [#allocation3 + $0x1], 0 }
   0x5   :  { %14 = vsyncpa [#allocation4], 0 }
   0x6   :  { %16 = vsyncpa [#allocation4 + $0x1], 0 }
   0x7   :  { %17 = vsyncpa [#allocation8], 0 }
   0x8   :  { %19 = vsyncpa [#allocation8 + $0x1], 0  ;;  %s1721_s18 = smov 0   ;;  %s1723_s19 = smov 0  }
   0x9   :  { %s1725_s20 = smov 0   ;;  %s1727_s21 = smov 0  }
   0xa LB: > { %2332 = sst [smem:[#allocation12_spill]] %s1607_s20  ;;  %s1742_s22 = sadd.s32 4294967295, %s1611_s21   ;;  %s1611_s21 = sphi %s1727_s21, %s2367_s21   ;;  %s1607_s20 = sphi %s1725_s20, %s2364_s20   ;;  %s1603_s19 = sphi %s1723_s19, %s2366_s19   ;;  %s1599_s18 = sphi %s1721_s18, %s2365_s18  }
   0xb   : > { %s1116_s23 = sadd.s32 4294967294, %s1611_s21   ;;  %s1746_s24 = sadd.s32 1, %s1611_s21  }
   0xc   : > { %s32_s25 = sadd.s32 1, %s1607_s20  ;;  %s29_s26 = ssub.s32 %s1611_s21, %s1746_s24 }
   0xd   : > { %p39_p0 = scmp.ne.s32.totalorder %s1607_s20, %s1603_s19  ;;  %p30_p1 = scmp.eq.s32.totalorder %s29_s26, 0 }
   0xe   : > { %p40_p2 = scmp.eq.s32.totalorder %s1611_s21, 0  ;;  %p45_p3 = scmp.ne.s32.totalorder %s1603_s19, %s1599_s18 }
   0xf   : > { %p46_p4 = scmp.eq.s32.totalorder %s1742_s22, 0  ;;  %p137_p7 = scmp.eq.s32.totalorder %s1742_s22, 1 }
  0x10   : > { %s1758_s27 = scalar_select %p30_p1, %s1607_s20, %s32_s25  }
  0x11   : > { %p1760_p5 = por %p40_p2, %p39_p0  ;;  %p1764_p6 = por %p46_p4, %p45_p3 }
  0x12   : > { %2333 = sst [smem:[#allocation13_spill]] %s1758_s27  ;;  %p143_p8 = scmp.eq.s32.totalorder %s1116_s23, 1 }
  0x13   : > { %p1769_p9 = por %p137_p7, %p39_p0  ;;  %p2328_p11 = scmp.ge.s32.totalorder %s1611_s21, 2 }
  0x14   : > { %p1773_p10 = por %p143_p8, %p45_p3 }
  0x15   : > { %191 = sbr.rel (%p2328_p11) target bundleno = 226 (0xe2), region = 24 }
  0x16   : > { %s2337_s6 = scalar_select %p1773_p10, 1, 0 }
  0x1a   : > { %194 = sbr.rel (!%p1760_p5) target bundleno = 69 (0x45), region = 28  ;;  %s195_s7 = sand.u32 (%p1760_p5), 1, %s1607_s20  }
  0x1b   : > { %s1120_s8 = sshll.u32 (%p1760_p5), %s1611_s21, 1  ;;  %s1119_s9 = sshll.u32 (%p1760_p5), %s195_s7, 6 }
  0x1c   : > { %s201_s10 = ssub.s32 (%p1760_p5), 3, %s1120_s8  ;;  %s1787_s14 = scalar_lea.sflag (%p1760_p5), [#allocation3], %s195_s7 }
  0x1d   : > { %p202_p12 = scmp.lt.s32.totalorder (%p1760_p5), %s201_s10, 2  ;;  %s199_s15 = scalar_lea.vmem (%p1760_p5), [#allocation2], %s1119_s9 }
  0x1f   : > { %s2369_s10 = smov (!%p202_p12, %s201_s10), 2 }
  0x20   : > { %s1121_s11 = sshll.u32 %s2369_s10, 5 }
  0x21   : > { %s205_s12 = ssub.s32 64, %s1121_s11 }
  0x22   : > { %s206_s13 = sshll.u32 %s205_s12, 4 }
  0x23   : > { %207 = vsyncadd %s1787_s14, %s206_s13  ;;  %p1790_p13 = scmp.ne.s32.totalorder %s1121_s11, 0  ;;  %s1167_s17 = sshll.u32 %s1611_s21, 4 }
  0x24   : > { %s2339_s0 = sld [smem:[#allocation14_spill]]  ;;  %s1799_s12 = sshll.u32 %s199_s15, 4  ;;  %s216_s12 = int_to_ptr.vmem [resolvable:$true] %s1799_s12 }
  0x25   : > { %s2327_s9 = sshll.u32 %s2369_s10, 9 }
  0x26   : > { %s1390_s13 = sshrl.u32 %s2327_s9, 4 }
  0x2a   : > { %s210_s26 = scalar_lea.hbm %s2339_s0, %s1167_s17  ;;  %s1399_s15 = scalar_lea.hbm %s2339_s0, 96 }
  0x2b   : > { %s213_s7 = sshll.u32 %s210_s26, 4  ;;  %s1801_s7 = int_to_ptr.hbm [resolvable:$true] %s213_s7 }
  0x2c   : > { %s1388_s11 = sshra.s32 %s1801_s7, 4  ;;  %s1389_s11 = int_to_ptr.hbm [resolvable:$true] %s1388_s11 }
  0x2d   : > { %s1395_s27 = scalar_lea.hbm %s1389_s11, %s1390_s13  ;;  %p1400_p3 = scmp.lt.s32.totalorder %s1389_s11, %s2339_s0 }
  0x2e   : > { %p1396_p0 = scmp.ne.s32.totalorder %s1389_s11, %s1395_s27  ;;  %p1401_p4 = scmp.lt.s32.totalorder %s1399_s15, %s1395_s27 }
  0x30   : > { %p1397_p1 = pnand %p1396_p0, %p1790_p13  ;;  %p1402_p7 = por %p1401_p4, %p1400_p3 }
  0x32   : > { %p1398_p2 = pneg %p1397_p1 }
  0x34   : > { %p1403_p8 = pnand %p1402_p7, %p1398_p2 }
  0x36   : > { %1406 = shalt.err (!%p1403_p8)
}
  0x37   : > { %s1407_s9 = sshra.s32 %s216_s12, 4  ;;  %s1677_s17 = smov [#allocation2]   ;;  %s1408_s9 = int_to_ptr.vmem [resolvable:$true] %s1407_s9 }
  0x38   : > { %s1414_s8 = scalar_lea.vmem %s1408_s9, %s1390_s13  ;;  %s1418_s23 = scalar_lea.vmem %s1677_s17, 128 }
  0x39   : > { %p1415_p12 = scmp.ne.s32.totalorder %s1408_s9, %s1414_s8  ;;  %p1420_p11 = scmp.lt.s32.totalorder %s1418_s23, %s1414_s8 }
  0x3b   : > { %p1416_p0 = pnand %p1415_p12, %p1790_p13 }
  0x3d   : > { %p1417_p1 = pneg %p1416_p0 }
  0x3f   : > { %p1422_p10 = pnand %p1420_p11, %p1417_p1 }
  0x41   : > { %1425 = shalt.err (!%p1422_p10)
}
  0x42   : > { %s1678_s11 = smov 384   ;;  %s1679_s27 = smov 256  }
  0x43   : > { %s2340_s15 = sshll.u32 %s2369_s10, 3  ;;  %s2341_s9 = sshll.u32 %s2369_s10, 9 }
  0x44   : > { %221 = dma.hbm_to_vmem [thread:$0]  (%p1790_p13), %s1801_s7, %s2341_s9, %s216_s12, %s1787_s14, %s1678_s11, %s1679_s27, %s2340_s15  }
  0x45 PF: > { %224 = sbr.rel (!%p1760_p5) target bundleno = 226 (0xe2), region = 32  ;;  %s226_s8 = sand.u32 (%p1760_p5), 1, %s1607_s20  }
  0x46   : > { %s1127_s13 = sshll.u32 (%p1760_p5), %s1611_s21, 1  ;;  %s1175_s25 = smul.u32 (%p1760_p5), 24, %s226_s8 }
  0x47   : > { %s230_s26 = ssub.s32 (%p1760_p5), 3, %s1127_s13  ;;  %s1170_s17 = sshll.u32 (%p1760_p5), %s1611_s21, 3 }
  0x48   : > { %p231_p10 = scmp.lt.s32.totalorder (%p1760_p5), %s230_s26, 2  ;;  %s2342_s1 = sld [smem:[#allocation15_spill]] (%p1760_p5) }
  0x49   : > { %s1842_s28 = scalar_lea.vmem (%p1760_p5), [#allocation5], %s1175_s25  }
  0x4a   : > { %s2371_s26 = smov (!%p231_p10, %s230_s26), 2 }
  0x4b   : > { %s233_s10 = smul.u32 12, %s2371_s26  ;;  %s1840_s14 = sshll.u32 %s2371_s26, 2 }
  0x4d   : > { %p1131_p5 = scmp.eq.s32.totalorder %s233_s10, 0 }
  0x4e   : > { %s1838_s16 = scalar_lea.vmem %s2342_s1, %s1170_s17   ;;  %p241_p11 = scmp.lt.u32.totalorder (!%p1131_p5), %s1840_s14, 8 }
  0x4f   : > { %240 = sbr.rel (%p1131_p5) target bundleno = 226 (0xe2), region = 36 }
  0x54   : > { %244 = sbr.rel (%p241_p11) target bundleno = 215 (0xd7), region = 40  ;;  %s1846_s7 = sand.u32 (!%p241_p11), 7, %s1840_s14  }
  0x55   : > { %p265_p13 = scmp.eq.s32.totalorder (!%p241_p11), %s1846_s7, 0  ;;  %p1132_p2 = scmp.ne.s32.totalorder (!%p241_p11), %s1846_s7, 0 }
  0x59   : > { %268 = sbr.rel (%p1132_p2) target bundleno = 148 (0x94), region = 55  ;;  %s269_s0 = sshrl.u32 (!%p1132_p2), %s1840_s14, 3 }
  0x5a   : > { %1361 = sdivrem.u32 (!%p1132_p2), %s269_s0, 12 }
  0x63   : > { %s1853_s12 = spop.drf %1361 }
  0x64   : > { %s1363_s11 = spop.drf %1361  ;;  %p1133_p3 = scmp.le.s32.totalorder %s1853_s12, 0 }
  0x65   : > { %s2343_s27 = smov (!%p1133_p3), %s1842_s28  ;;  %s2344_s15 = smov (!%p1133_p3), %s1838_s16 }
  0x66   : > { %1026 = sbr.rel (%p1133_p3) target bundleno = 122 (0x7a), region = 184  ;;  %s1862_s9 = smov (!%p1133_p3), 0  }
  0x67   : > { %s1864_s8 = smov (!%p1133_p3), 0  }
  0x6b LB: >> { %v281_v0 = vld [vmem:[%s1619_s15] sm:$0xff]  ;;  %v305_v1 = vld [vmem:[%s1619_s15 + $0xc] sm:$0xff]  ;;  %v329_v2 = vld [vmem:[%s1619_s15 + $0x18] sm:$0xff]  ;;  %s353_s13 = sadd.s32 1, %s1623_s9  ;;  %s275_s8 = sadd.s32 1, %s1627_s8   ;;  %s1627_s8 = sphi %s1864_s8, %s275_s8   ;;  %s1623_s9 = sphi %s1862_s9, %s2347_s9   ;;  %s1619_s15 = sphi %s2344_s15, %s2346_s15   ;;  %s1615_s27 = sphi %s2343_s27, %s2345_s27  }
  0x6c   : >> { %282 = vst [vmem:[%s1615_s27] sm:$0xff] %v281_v0  ;;  %v331_v3 = vld [vmem:[%s1619_s15 + $0x20] sm:$0xff]  ;;  %v333_v4 = vld [vmem:[%s1619_s15 + $0x28] sm:$0xff]  ;;  %v335_v5 = vld [vmem:[%s1619_s15 + $0x30] sm:$0xff]  ;;  %p354_p4 = scmp.ge.s32.totalorder %s353_s13, %s1853_s12  ;;  %p274_p7 = scmp.ge.s32.totalorder %s275_s8, %s1853_s12 }
  0x6d   : >> { %306 = vst [vmem:[%s1615_s27 + $0x8] sm:$0xff] %v305_v1  ;;  %v337_v6 = vld [vmem:[%s1619_s15 + $0x38] sm:$0xff]  ;;  %v339_v7 = vld [vmem:[%s1619_s15 + $0x40] sm:$0xff]  ;;  %v341_v8 = vld [vmem:[%s1619_s15 + $0x48] sm:$0xff] }
  0x6e   : >> { %330 = vst [vmem:[%s1615_s27 + $0x10] sm:$0xff] %v329_v2  ;;  %s2373_s13 = smov (%p354_p4, %s353_s13), 0  ;;  %v343_v9 = vld [vmem:[%s1619_s15 + $0x50] sm:$0xff]  ;;  %v345_v10 = vld [vmem:[%s1619_s15 + $0x58] sm:$0xff]  ;;  %v347_v11 = vld [vmem:[%s1619_s15 + $0x60] sm:$0xff] }
  0x6f   : >> { %332 = vst [vmem:[%s1615_s27 + $0x18] sm:$0xff] %v331_v3  ;;  %s356_s25 = smul.u32 96, %s2373_s13  ;;  %v349_v12 = vld [vmem:[%s1619_s15 + $0x68] sm:$0xff]  ;;  %v351_v13 = vld [vmem:[%s1619_s15 + $0x70] sm:$0xff]  ;;  %s2347_s9 = smov %s2373_s13 }
  0x70   : >> { %334 = vst [vmem:[%s1615_s27 + $0x20] sm:$0xff] %v333_v4 }
  0x71   : >> { %336 = vst [vmem:[%s1615_s27 + $0x28] sm:$0xff] %v335_v5  ;;  %s358_s26 = scalar_lea.vmem %s1838_s16, %s356_s25   ;;  %s359_s17 = scalar_lea.vmem %s1842_s28, %s356_s25 [#allocation5]  }
  0x72   : >> { %338 = vst [vmem:[%s1615_s27 + $0x30] sm:$0xff] %v337_v6  ;;  %s2346_s15 = smov %s358_s26 }
  0x73   : >> { %340 = vst [vmem:[%s1615_s27 + $0x38] sm:$0xff] %v339_v7 }
  0x74   : >> { %342 = vst [vmem:[%s1615_s27 + $0x40] sm:$0xff] %v341_v8 }
  0x75   : >> { %344 = vst [vmem:[%s1615_s27 + $0x48] sm:$0xff] %v343_v9  ;;  %277 = sbr.rel (!%p274_p7) target bundleno = 107 (0x6b), region = 190 }
  0x76   : >> { %346 = vst [vmem:[%s1615_s27 + $0x50] sm:$0xff] %v345_v10 }
  0x77   : >> { %348 = vst [vmem:[%s1615_s27 + $0x58] sm:$0xff] %v347_v11 }
  0x78   : >> { %350 = vst [vmem:[%s1615_s27 + $0x60] sm:$0xff] %v349_v12 }
  0x79   : >> { %352 = vst [vmem:[%s1615_s27 + $0x68] sm:$0xff] %v351_v13  ;;  %s2345_s27 = smov %s359_s17 }
  0x7a PF: > { %1364 = sdivrem.u32 %s269_s0, 12 }
  0x7b   : > { %s1134_s23 = smul.u32 96, %s1853_s12 }
  0x7d   : > { %s1921_s10 = scalar_lea.vmem %s1838_s16, %s1134_s23   ;;  %s1924_s11 = scalar_lea.vmem %s1842_s28, %s1134_s23 [#allocation5]  }
  0x83   : > { %s1365_s25 = spop.drf %1364 }
  0x84   : > { %s1926_s17 = spop.drf %1364 }
  0x85   : > { %p1136_p8 = scmp.le.s32.totalorder %s1926_s17, 0 }
  0x86   : > { %s2348_s27 = smov (!%p1136_p8), %s1924_s11  ;;  %s1633_s15 = smov (!%p1136_p8), %s1921_s10  }
  0x87   : > { %1040 = sbr.rel (%p1136_p8) target bundleno = 148 (0x94), region = 195  ;;  %s1637_s9 = smov (!%p1136_p8), 0  }
  0x88   : > { %s1641_s8 = smov (!%p1136_p8), 0  }
  0x8c LB: >> { %v376_v14 = vld [vmem:[%s1635_s15] sm:$0xff]  ;;  %v378_v15 = vld [vmem:[%s1635_s15 + $0xc] sm:$0xff]  ;;  %v380_v16 = vld [vmem:[%s1635_s15 + $0x18] sm:$0xff]  ;;  %s382_s0 = sadd.s32 1, %s1639_s9  ;;  %s370_s8 = sadd.s32 1, %s1643_s8   ;;  %s1643_s8 = sphi %s1641_s8, %s370_s8   ;;  %s1639_s9 = sphi %s1637_s9, %s1638_s9   ;;  %s1635_s15 = sphi %s1633_s15, %s387_s15   ;;  %s1631_s27 = sphi %s2348_s27, %s388_s27  }
  0x8d   : >> { %377 = vst [vmem:[%s1631_s27] sm:$0xff] %v376_v14  ;;  %p383_p12 = scmp.ge.s32.totalorder %s382_s0, %s1926_s17  ;;  %p369_p0 = scmp.ge.s32.totalorder %s370_s8, %s1926_s17 }
  0x8e   : >> { %379 = vst [vmem:[%s1631_s27 + $0x8] sm:$0xff] %v378_v15 }
  0x8f   : >> { %381 = vst [vmem:[%s1631_s27 + $0x10] sm:$0xff] %v380_v16  ;;  %s2375_s0 = smov (%p383_p12, %s382_s0), 0  ;;  %372 = sbr.rel (!%p369_p0) target bundleno = 140 (0x8c), region = 201 }
  0x90   : >> { %s1137_s12 = sshll.u32 %s2375_s0, 3  ;;  %s1638_s9 = smov %s2375_s0  }
  0x91   : >> { %s387_s15 = scalar_lea.vmem %s1921_s10, %s1137_s12   ;;  %s388_s27 = scalar_lea.vmem %s1924_s11, %s1137_s12 [#allocation5]  }
  0x94 PF: > { %391 = sbr.rel (%p265_p13) target bundleno = 215 (0xd7), region = 73  ;;  %s393_s13 = ssub.s32 (!%p265_p13), %s1840_s14, %s1846_s7 }
  0x95   : > { %s397_s26 = sshrl.u32 (!%p265_p13), %s1840_s14, 3  ;;  %s1946_s23 = scalar_lea.vmem (!%p265_p13), %s1838_s16, %s393_s13 }
  0x96   : > { %s1949_s25 = scalar_lea.vmem (!%p265_p13), %s1842_s28, %s393_s13 [#allocation5]  ;;  %1367 = sdivrem.u32 (!%p265_p13), %s397_s26, 12 }
  0x9f   : > { %s1953_s27 = spop.drf %1367 }
  0xa0   : > { %s1369_s10 = spop.drf %1367  ;;  %p1139_p1 = scmp.le.s32.totalorder %s1953_s27, 0 }
  0xa1   : > { %s2349_s11 = smov (!%p1139_p1), %s1842_s28  ;;  %s2350_s17 = smov (!%p1139_p1), %s1838_s16 }
  0xa2   : > { %1054 = sbr.rel (%p1139_p1) target bundleno = 182 (0xb6), region = 206  ;;  %s1962_s15 = smov (!%p1139_p1), 0  }
  0xa3   : > { %s1964_s9 = smov (!%p1139_p1), 0  }
  0xa7 LB: >> { %v409_v17 = vld [vmem:[%s1651_s17] sm:$0xff]  ;;  %v433_v18 = vld [vmem:[%s1651_s17 + $0xc] sm:$0xff]  ;;  %v457_v19 = vld [vmem:[%s1651_s17 + $0x18] sm:$0xff]  ;;  %s481_s8 = sadd.s32 1, %s1655_s15  ;;  %s403_s9 = sadd.s32 1, %s1659_s9   ;;  %s1659_s9 = sphi %s1964_s9, %s403_s9   ;;  %s1655_s15 = sphi %s1962_s15, %s2353_s15   ;;  %s1651_s17 = sphi %s2350_s17, %s2352_s17   ;;  %s1647_s11 = sphi %s2349_s11, %s2351_s11  }
  0xa8   : >> { %410 = vst [vmem:[%s1647_s11] sm:$0xff] %v409_v17  ;;  %v459_v20 = vld [vmem:[%s1651_s17 + $0x20] sm:$0xff]  ;;  %v461_v21 = vld [vmem:[%s1651_s17 + $0x28] sm:$0xff]  ;;  %v463_v22 = vld [vmem:[%s1651_s17 + $0x30] sm:$0xff]  ;;  %p482_p10 = scmp.ge.s32.totalorder %s481_s8, %s1953_s27  ;;  %p402_p5 = scmp.ge.s32.totalorder %s403_s9, %s1953_s27 }
  0xa9   : >> { %434 = vst [vmem:[%s1647_s11 + $0x8] sm:$0xff] %v433_v18  ;;  %v465_v23 = vld [vmem:[%s1651_s17 + $0x38] sm:$0xff]  ;;  %v467_v24 = vld [vmem:[%s1651_s17 + $0x40] sm:$0xff]  ;;  %v469_v25 = vld [vmem:[%s1651_s17 + $0x48] sm:$0xff] }
  0xaa   : >> { %458 = vst [vmem:[%s1647_s11 + $0x10] sm:$0xff] %v457_v19  ;;  %s2377_s8 = smov (%p482_p10, %s481_s8), 0  ;;  %v471_v26 = vld [vmem:[%s1651_s17 + $0x50] sm:$0xff]  ;;  %v473_v27 = vld [vmem:[%s1651_s17 + $0x58] sm:$0xff]  ;;  %v475_v28 = vld [vmem:[%s1651_s17 + $0x60] sm:$0xff] }
  0xab   : >> { %460 = vst [vmem:[%s1647_s11 + $0x18] sm:$0xff] %v459_v20  ;;  %s484_s0 = smul.u32 96, %s2377_s8  ;;  %v477_v29 = vld [vmem:[%s1651_s17 + $0x68] sm:$0xff]  ;;  %v479_v30 = vld [vmem:[%s1651_s17 + $0x70] sm:$0xff]  ;;  %s2353_s15 = smov %s2377_s8 }
  0xac   : >> { %462 = vst [vmem:[%s1647_s11 + $0x20] sm:$0xff] %v461_v21 }
  0xad   : >> { %464 = vst [vmem:[%s1647_s11 + $0x28] sm:$0xff] %v463_v22  ;;  %s486_s12 = scalar_lea.vmem %s1838_s16, %s484_s0   ;;  %s487_s13 = scalar_lea.vmem %s1842_s28, %s484_s0 [#allocation5]  }
  0xae   : >> { %466 = vst [vmem:[%s1647_s11 + $0x30] sm:$0xff] %v465_v23  ;;  %s2352_s17 = smov %s486_s12 }
  0xaf   : >> { %468 = vst [vmem:[%s1647_s11 + $0x38] sm:$0xff] %v467_v24 }
  0xb0   : >> { %470 = vst [vmem:[%s1647_s11 + $0x40] sm:$0xff] %v469_v25 }
  0xb1   : >> { %472 = vst [vmem:[%s1647_s11 + $0x48] sm:$0xff] %v471_v26  ;;  %405 = sbr.rel (!%p402_p5) target bundleno = 167 (0xa7), region = 212 }
  0xb2   : >> { %474 = vst [vmem:[%s1647_s11 + $0x50] sm:$0xff] %v473_v27 }
  0xb3   : >> { %476 = vst [vmem:[%s1647_s11 + $0x58] sm:$0xff] %v475_v28 }
  0xb4   : >> { %478 = vst [vmem:[%s1647_s11 + $0x60] sm:$0xff] %v477_v29 }
  0xb5   : >> { %480 = vst [vmem:[%s1647_s11 + $0x68] sm:$0xff] %v479_v30  ;;  %s2351_s11 = smov %s487_s13 }
  0xb6 PF: > { %1370 = sdivrem.u32 %s397_s26, 12 }
  0xb7   : > { %s1140_s10 = smul.u32 96, %s1953_s27 }
  0xb9   : > { %s2021_s0 = scalar_lea.vmem %s1838_s16, %s1140_s10   ;;  %s2024_s1 = scalar_lea.vmem %s1842_s28, %s1140_s10 [#allocation5]  }
  0xbf   : > { %s1371_s13 = spop.drf %1370 }
  0xc0   : > { %s2026_s20 = spop.drf %1370 }
  0xc1   : > { %p1142_p11 = scmp.le.s32.totalorder %s2026_s20, 0 }
  0xc2   : > { %s2354_s11 = smov (!%p1142_p11), %s2024_s1  ;;  %s1665_s17 = smov (!%p1142_p11), %s2021_s0  }
  0xc3   : > { %1068 = sbr.rel (%p1142_p11) target bundleno = 208 (0xd0), region = 217  ;;  %s1669_s15 = smov (!%p1142_p11), 0  }
  0xc4   : > { %s1673_s9 = smov (!%p1142_p11), 0  }
  0xc8 LB: >> { %v504_v31 = vld [vmem:[%s1667_s17] sm:$0xff]  ;;  %v506_v32 = vld [vmem:[%s1667_s17 + $0xc] sm:$0xff]  ;;  %v508_v33 = vld [vmem:[%s1667_s17 + $0x18] sm:$0xff]  ;;  %s510_s26 = sadd.s32 1, %s1671_s15  ;;  %s498_s9 = sadd.s32 1, %s1675_s9   ;;  %s1675_s9 = sphi %s1673_s9, %s498_s9   ;;  %s1671_s15 = sphi %s1669_s15, %s1670_s15   ;;  %s1667_s17 = sphi %s1665_s17, %s515_s17   ;;  %s1663_s11 = sphi %s2354_s11, %s516_s11  }
  0xc9   : >> { %505 = vst [vmem:[%s1663_s11] sm:$0xff] %v504_v31  ;;  %p511_p13 = scmp.ge.s32.totalorder %s510_s26, %s2026_s20  ;;  %p497_p2 = scmp.ge.s32.totalorder %s498_s9, %s2026_s20 }
  0xca   : >> { %507 = vst [vmem:[%s1663_s11 + $0x8] sm:$0xff] %v506_v32 }
  0xcb   : >> { %509 = vst [vmem:[%s1663_s11 + $0x10] sm:$0xff] %v508_v33  ;;  %s2379_s26 = smov (%p511_p13, %s510_s26), 0  ;;  %500 = sbr.rel (!%p497_p2) target bundleno = 200 (0xc8), region = 223 }
  0xcc   : >> { %s1143_s27 = sshll.u32 %s2379_s26, 3  ;;  %s1670_s15 = smov %s2379_s26  }
  0xcd   : >> { %s515_s17 = scalar_lea.vmem %s2021_s0, %s1143_s27   ;;  %s516_s11 = scalar_lea.vmem %s2024_s1, %s1143_s27 [#allocation5]  }
  0xd0 PF: > { %s1680_s8 = smov 1  }
  0xd1   : > { %s517_s12 = sshll.u32 %s1680_s8, %s1846_s7 }
  0xd2   : > { %s1145_s10 = sadd.s32 4294967295, %s517_s12 }
  0xd3   : > { %v527_v34 = vld [vmem:[%s1946_s23] sm:%s1145_s10]  ;;  %v529_v35 = vld [vmem:[%s1946_s23 + $0xc] sm:%s1145_s10] }
  0xd4   : > { %528 = vst [vmem:[%s1949_s25] sm:%s1145_s10] %v527_v34  ;;  %v531_v36 = vld [vmem:[%s1946_s23 + $0x18] sm:%s1145_s10] }
  0xd5   : > { %530 = vst [vmem:[%s1949_s25 + $0x8] sm:%s1145_s10] %v529_v35 }
  0xd6   : > { %532 = vst [vmem:[%s1949_s25 + $0x10] sm:%s1145_s10] %v531_v36 }
  0xd7 PF: > { %p1146_p3 = scmp.ge.u32.totalorder %s1840_s14, 8 }
  0xd8   : > { %s1681_s1 = smov (!%p1146_p3), 1  }
  0xd9   : > { %247 = sbr.rel (%p1146_p3) target bundleno = 226 (0xe2), region = 44  ;;  %s248_s20 = sshll.u32 (!%p1146_p3), %s1681_s1, %s1840_s14 }
  0xda   : > { %s1147_s7 = sadd.s32 (!%p1146_p3), 4294967295, %s248_s20 }
  0xde   : > { %v258_v37 = vld [vmem:[%s1838_s16] sm:%s1147_s7]  ;;  %v260_v38 = vld [vmem:[%s1838_s16 + $0xc] sm:%s1147_s7] }
  0xdf   : > { %259 = vst [vmem:[%s1842_s28] sm:%s1147_s7] %v258_v37  ;;  %v262_v39 = vld [vmem:[%s1838_s16 + $0x18] sm:%s1147_s7] }
  0xe0   : > { %261 = vst [vmem:[%s1842_s28 + $0x8] sm:%s1147_s7] %v260_v38 }
  0xe1   : > { %263 = vst [vmem:[%s1842_s28 + $0x10] sm:%s1147_s7] %v262_v39 }
  0xe2 PF: > { %p1148_p4 = scmp.ge.s32.totalorder %s1611_s21, 1  ;;  %p535_p7 = scmp.lt.s32.totalorder %s1611_s21, 3 }
  0xe4   : > { %p536_p8 = pnand %p1148_p4, %p535_p7 }
  0xe5   : > { %s2058_s14 = sand.u32 (!%p536_p8), 1, %s1603_s19  }
  0xe6   : > { %539 = sbr.rel (%p536_p8) target bundleno = 451 (0x1c3), region = 98  ;;  %s1149_s16 = sshll.u32 (!%p536_p8), %s2058_s14, 6 }
  0xe7   : > { %s542_s23 = scalar_lea.sflag (!%p536_p8), [#allocation3], %s2058_s14  ;;  %s2064_s28 = scalar_lea.vmem (!%p536_p8), [#allocation2], %s1149_s16 }
  0xeb   : > { %1586 = dma.done.wait (%p1764_p6), %s542_s23, 1024  }
  0xec   : > { %1588 = vsyncadd (%p1764_p6), %s542_s23, 4294966272  ;;  %s1176_s25 = smul.u32 24, %s2058_s14  ;;  %v1682_v40 = vmov 0   ;;  %v704_v47 = vld [vmem:[%s2323_s2 + $0x10] sm:$0xff]  ;;  %v702_v48 = vld [vmem:[%s2323_s2] sm:$0xff]  ;;  %v1683_v49 = vmov 4.0  }
  0xed   : > { %1374 = vset.pattern.permute.xlu1 %v1682_v40  ;;  %1373 = vset.pattern.permute.xlu0 %v1682_v40  ;;  %1376 = vrcp.f32 %v1683_v49  ;;  %v706_v51 = vld [vmem:[%s2324_s3] sm:$0xff]  ;;  %v705_v54 = vld [vmem:[%s2323_s2 + $0x18] sm:$0xff]  ;;  %v703_v55 = vld [vmem:[%s2323_s2 + $0x8] sm:$0xff]  ;;  %vm797_vm0 = vcmask 1043456   ;;  %v1684_v15 = vmov 32.0   ;;  %s1152_s13 = sshll.u32 (%p1769_p9), %s1742_s22, 1 }
  0xee   : > { %1375 = vset.pattern.permute.xlu2 %v1682_v40  ;;  %s554_s0 = scalar_lea.vmem [#allocation5], %s1176_s25  ;;  %730 = vperm.xlu1 %1374, %v704_v47   ;;  %v707_v57 = vld [vmem:[%s2324_s3 + $0x8] sm:$0xff]  ;;  %v709_v60 = vld [vmem:[%s2324_s3 + $0x18] sm:$0xff]  ;;  %v708_v61 = vld [vmem:[%s2324_s3 + $0x10] sm:$0xff]  ;;  %1378 = vrcp.f32 %v1684_v15  ;;  %s866_s11 = ssub.s32 (%p1769_p9), 3, %s1152_s13 }
  0xef   : > { %v2073_v41 = vld [vmem:[%s554_s0] sm:$0xff]  ;;  %v2075_v42 = vld [vmem:[%s554_s0 + $0x8] sm:$0xff]  ;;  %v2077_v43 = vld [vmem:[%s554_s0 + $0x10] sm:$0xff]  ;;  %720 = vperm.xlu0 %1373, %v702_v48   ;;  %748 = vperm.xlu2 %1375, %v706_v51   ;;  %p867_p6 = scmp.lt.s32.totalorder (%p1769_p9), %s866_s11, 2 }
  0xf0   : > { %v785_v44 = vmul.f32 %v2073_v41, %v2073_v41  ;;  %v786_v45 = vmul.f32 %v2075_v42, %v2075_v42  ;;  %v788_v46 = vmul.f32 %v2077_v43, %v2077_v43  ;;  %v609_v4 = vld [vmem:[%s2064_s28] sm:$0xff]  ;;  %v2113_v5 = vld [vmem:[%s2064_s28 + $0x8] sm:$0xff]  ;;  %v611_v6 = vld [vmem:[%s2064_s28 + $0x10] sm:$0xff] }
  0xf1   : > { %v2117_v8 = vld [vmem:[%s2064_s28 + $0x18] sm:$0xff]  ;;  %v617_v9 = vadd.f32 %v611_v6, %v609_v4  ;;  %v613_v12 = vld [vmem:[%s2064_s28 + $0x20] sm:$0xff]  ;;  %v614_v13 = vld [vmem:[%s2064_s28 + $0x28] sm:$0xff] }
  0xf2   : > { %v787_v50 = vadd.f32 %v786_v45, %v785_v44  ;;  %v626_v14 = vadd.f32 %v2117_v8, %v2113_v5  ;;  %v615_v19 = vld [vmem:[%s2064_s28 + $0x30] sm:$0xff]  ;;  %v616_v20 = vld [vmem:[%s2064_s28 + $0x38] sm:$0xff]  ;;  %s2179_s28 = scalar_lea.vmem [#allocation7], %s1176_s25  ;;  %s2190_s25 = scalar_lea.vmem [#allocation6], %s1149_s16 }
  0xf3   : > { %v1377_v56 = vpop.eup %1376  ;;  %v618_v16 = vadd.f32 %v617_v9, %v613_v12  ;;  %s853_s16 = scalar_lea.sflag [#allocation4], %s2058_s14 }
  0xf4   : > { %v789_v52 = vadd.f32 %v788_v46, %v787_v50  ;;  %v813_v58 = vmul.f32 4.0, %v1377_v56  ;;  %v627_v21 = vadd.f32 %v626_v14, %v614_v13  ;;  %vm817_vm1 = vweird.f32 %v1377_v56  ;;  %v1379_v31 = vpop.eup %1378 }
  0xf5   : > { %v619_v23 = vadd.f32 %v618_v16, %v615_v19  ;;  %v636_v36 = vmul.f32 32.0, %v1379_v31  ;;  %vm640_vm2 = vweird.f32 %v1379_v31 }
  0xf6   : > { %v790_v53 = vmax.f32 %v789_v52, 1e-08  ;;  %735 = vperm.xlu1 %1374, %v705_v54   ;;  %v814_v59 = vsub.f32 1.0, %v813_v58  ;;  %v628_v26 = vadd.f32 %v627_v21, %v616_v20 }
  0xf7   : > { %725 = vperm.xlu0 %1373, %v703_v55   ;;  %753 = vperm.xlu2 %1375, %v707_v57   ;;  %v620_v27 = vrot.slane %v619_v23, 4  ;;  %v637_v44 = vsub.f32 1.0, %v636_v36 }
  0xf8   : > { %792 = vst [vmem:[#allocation1] ss:$2 sm:$0xff] %v790_v53  ;;  %v815_v7 = vmul.f32 %v1377_v56, %v814_v59  ;;  %v629_v30 = vrot.slane %v628_v26, 4 }
  0xf9   : > { %v621_v33 = vadd.f32 %v620_v27, %v619_v23  ;;  %v638_v47 = vmul.f32 %v1379_v31, %v637_v44 }
  0xfa   : > { %v816_v22 = vadd.f32 %v1377_v56, %v815_v7  ;;  %v630_v37 = vadd.f32 %v629_v30, %v628_v26 }
  0xfb   : > { %v622_v38 = vrot.slane %v621_v33, 2  ;;  %v639_v50 = vadd.f32 %v1379_v31, %v638_v47 }
  0xfc   : > { %v818_v32 = vsel %vm817_vm1, %v1377_v56, %v816_v22  ;;  %v631_v45 = vrot.slane %v630_v37, 2 }
  0xfd   : > { %v623_v46 = vadd.f32 %v622_v38, %v621_v33  ;;  %v2125_v53 = vsel %vm640_vm2, %v1379_v31, %v639_v50 }
  0xfe   : > { %763 = vperm.xlu1 %1374, %v709_v60   ;;  %v632_v49 = vadd.f32 %v631_v45, %v630_v37 }
  0xff   : > { %v793_v62 = vld.sshfl [vmem:[#allocation1] sm:$0xff pattern:$0x75316420]  ;;  %v794_v63 = vld.sshfl [vmem:[#allocation1 + $0x8] sm:$0xff pattern:$0x75316420]  ;;  %758 = vperm.xlu0 %1373, %v708_v61  }
 0x100   : > { %v798_v0 = vsel %vm797_vm0, %v793_v62, 0.0  ;;  %v805_v1 = vsel %vm797_vm0, %v794_v63, 0.0  ;;  %v624_v48 = vrot.slane %v623_v46, 1  ;;  %v633_v52 = vrot.slane %v632_v49, 1 }
 0x101   : > { %v799_v2 = vrot.slane %v798_v0, 4  ;;  %v806_v3 = vrot.slane %v805_v1, 4 }
 0x102   : > { %v625_v51 = vadd.f32 %v624_v48, %v623_v46  ;;  %v634_v54 = vadd.f32 %v633_v52, %v632_v49 }
 0x103   : > { %v800_v10 = vadd.f32 %v799_v2, %v798_v0  ;;  %v807_v11 = vadd.f32 %v806_v3, %v805_v1 }
 0x104   : > { %v642_v55 = vmul.f32 %v2125_v53, %v625_v51  ;;  %v643_v59 = vmul.f32 %v2125_v53, %v634_v54 }
 0x105   : > { %v801_v17 = vrot.slane %v800_v10, 2  ;;  %v808_v18 = vrot.slane %v807_v11, 2 }
 0x106   : > { %v2129_v60 = vsub.f32 %v609_v4, %v642_v55  ;;  %v2131_v62 = vsub.f32 %v611_v6, %v642_v55  ;;  %v2134_v0 = vsub.f32 %v2113_v5, %v643_v59  ;;  %v2137_v1 = vsub.f32 %v2117_v8, %v643_v59 }
 0x107   : > { %v802_v24 = vadd.f32 %v801_v17, %v800_v10  ;;  %v809_v25 = vadd.f32 %v808_v18, %v807_v11  ;;  %v2139_v2 = vsub.f32 %v613_v12, %v642_v55  ;;  %v2141_v7 = vsub.f32 %v614_v13, %v643_v59 }
 0x108   : > { %v652_v4 = vmul.f32 %v2129_v60, %v2129_v60  ;;  %v654_v9 = vmul.f32 %v2131_v62, %v2131_v62  ;;  %v2147_v10 = vsub.f32 %v615_v19, %v642_v55  ;;  %v2149_v11 = vsub.f32 %v616_v20, %v643_v59 }
 0x109   : > { %v803_v28 = vrot.slane %v802_v24, 1  ;;  %v810_v29 = vrot.slane %v809_v25, 1  ;;  %v653_v5 = vmul.f32 %v2134_v0, %v2134_v0  ;;  %v655_v12 = vmul.f32 %v2137_v1, %v2137_v1 }
 0x10a   : > { %v656_v13 = vmul.f32 %v2139_v2, %v2139_v2  ;;  %v657_v14 = vmul.f32 %v2141_v7, %v2141_v7  ;;  %v658_v16 = vmul.f32 %v2147_v10, %v2147_v10  ;;  %v660_v17 = vadd.f32 %v654_v9, %v652_v4 }
 0x10b   : > { %v804_v34 = vadd.f32 %v803_v28, %v802_v24  ;;  %v811_v35 = vadd.f32 %v810_v29, %v809_v25  ;;  %v659_v20 = vmul.f32 %v2149_v11, %v2149_v11  ;;  %v669_v21 = vadd.f32 %v655_v12, %v653_v5 }
 0x10c   : > { %v661_v23 = vadd.f32 %v660_v17, %v656_v13 }
 0x10d   : > { %v819_v39 = vmul.f32 %v818_v32, %v804_v34  ;;  %v820_v40 = vmul.f32 %v818_v32, %v811_v35  ;;  %v670_v25 = vadd.f32 %v669_v21, %v657_v14 }
 0x10e   : > { %v662_v26 = vadd.f32 %v661_v23, %v658_v16 }
 0x10f   : > { %1380 = vrsqrt.f32 %v819_v39  ;;  %vm827_vm3 = vweird.f32 %v819_v39  ;;  %vm837_vm4 = vweird.f32 %v820_v40  ;;  %v671_v29 = vadd.f32 %v670_v25, %v659_v20 }
 0x110   : > { %1382 = vrsqrt.f32 %v820_v40  ;;  %v663_v31 = vrot.slane %v662_v26, 4 }
 0x111   : > { %v672_v32 = vrot.slane %v671_v29, 4 }
 0x112   : > { %v664_v34 = vadd.f32 %v663_v31, %v662_v26 }
 0x113   : > { %v673_v38 = vadd.f32 %v672_v32, %v671_v29 }
 0x115   : > { %v1381_v56 = vpop.eup %1380 }
 0x116   : > { %v1383_v57 = vpop.eup %1382  ;;  %v822_v58 = vmul.f32 %v1381_v56, %v819_v39  ;;  %vm828_vm5 = vweird.f32 %v1381_v56  ;;  %v665_v39 = vrot.slane %v664_v34, 2 }
 0x117   : > { %v832_v61 = vmul.f32 %v1383_v57, %v820_v40  ;;  %vm838_vm6 = vweird.f32 %v1383_v57  ;;  %vm2163_vm7 = vmor %vm827_vm3, %vm828_vm5  ;;  %v674_v40 = vrot.slane %v673_v38, 2 }
 0x118   : > { %v823_v63 = vmul.f32 %v1381_v56, %v822_v58  ;;  %vm839_vm8 = vmor %vm837_vm4, %vm838_vm6  ;;  %v666_v44 = vadd.f32 %v665_v39, %v664_v34 }
 0x119   : > { %v833_v3 = vmul.f32 %v1383_v57, %v832_v61  ;;  %v675_v45 = vadd.f32 %v674_v40, %v673_v38 }
 0x11a   : > { %v824_v6 = vmul.f32 0.5, %v823_v63  ;;  %v667_v46 = vrot.slane %v666_v44, 1 }
 0x11b   : > { %v834_v8 = vmul.f32 0.5, %v833_v3 }
 0x11c   : > { %v825_v15 = vsub.f32 1.5, %v824_v6  ;;  %v668_v47 = vadd.f32 %v667_v46, %v666_v44 }
 0x11d   : > { %v835_v19 = vsub.f32 1.5, %v834_v8 }
 0x11e   : > { %v826_v22 = vmul.f32 %v1381_v56, %v825_v15 }
 0x11f   : > { %v836_v24 = vmul.f32 %v1383_v57, %v835_v19 }
 0x120   : > { %v830_v27 = vsel %vm2163_vm7, %v1381_v56, %v826_v22 }
 0x121   : > { %v840_v28 = vsel %vm839_vm8, %v1383_v57, %v836_v24 }
 0x122   : > { %v843_v30 = vrot.slane %v840_v28, 4 }
 0x124   : > { %v844_v33 = vsel %vm797_vm0, %v830_v27, %v843_v30 }
 0x125   : > { %v846_v35 = vmul.f32 %v844_v33, %v2073_v41  ;;  %v847_v36 = vmul.f32 %v844_v33, %v2075_v42  ;;  %v848_v37 = vmul.f32 %v844_v33, %v2077_v43  ;;  %v676_v41 = vrot.slane %v675_v45, 1 }
 0x126   : > { %v678_v43 = vmul.f32 %v668_v47, %v2125_v53 }
 0x127   : > { %849 = vst [vmem:[%s2179_s28] sm:$0xff] %v846_v35  ;;  %v677_v42 = vadd.f32 %v676_v41, %v675_v45 }
 0x128   : > { %850 = vst [vmem:[%s2179_s28 + $0x8] sm:$0xff] %v847_v36  ;;  %v680_v49 = vadd.f32 1e-05, %v678_v43 }
 0x129   : > { %851 = vst [vmem:[%s2179_s28 + $0x10] sm:$0xff] %v848_v37  ;;  %v679_v48 = vmul.f32 %v677_v42, %v2125_v53 }
 0x12a   : > { %1384 = vrsqrt.f32 %v680_v49  ;;  %vm688_vm9 = vweird.f32 %v680_v49 }
 0x12b   : > { %v681_v50 = vadd.f32 1e-05, %v679_v48 }
 0x12d   : > { %1386 = vrsqrt.f32 %v681_v50  ;;  %vm698_vm11 = vweird.f32 %v681_v50 }
 0x130   : > { %v1385_v51 = vpop.eup %1384 }
 0x131   : > { %v683_v54 = vmul.f32 %v1385_v51, %v680_v49  ;;  %vm689_vm10 = vweird.f32 %v1385_v51 }
 0x132   : > { %vm690_vm13 = vmor %vm688_vm9, %vm689_vm10 }
 0x133   : > { %v1387_v52 = vpop.eup %1386  ;;  %v684_v56 = vmul.f32 %v1385_v51, %v683_v54 }
 0x134   : > { %v693_v55 = vmul.f32 %v1387_v52, %v681_v50  ;;  %vm699_vm12 = vweird.f32 %v1387_v52 }
 0x135   : > { %v685_v58 = vmul.f32 0.5, %v684_v56  ;;  %vm700_vm14 = vmor %vm698_vm11, %vm699_vm12 }
 0x136   : > { %v694_v57 = vmul.f32 %v1387_v52, %v693_v55 }
 0x137   : > { %v686_v61 = vsub.f32 1.5, %v685_v58 }
 0x138   : > { %v695_v59 = vmul.f32 0.5, %v694_v57 }
 0x139   : > { %v687_v53 = vmul.f32 %v1385_v51, %v686_v61 }
 0x13a   : > { %v696_v63 = vsub.f32 1.5, %v695_v59 }
 0x13b   : > { %v691_v4 = vsel %vm690_vm13, %v1385_v51, %v687_v53 }
 0x13c   : > { %v697_v3 = vmul.f32 %v1387_v52, %v696_v63  ;;  %v710_v6 = vmul.f32 %v691_v4, %v2129_v60  ;;  %v712_v18 = vmul.f32 %v691_v4, %v2131_v62  ;;  %v714_v22 = vmul.f32 %v691_v4, %v2139_v2 }
 0x13d   : > { %v716_v24 = vmul.f32 %v691_v4, %v2147_v10 }
 0x13e   : > { %v701_v9 = vsel %vm700_vm14, %v1387_v52, %v697_v3 }
 0x13f   : > { %v711_v5 = vmul.f32 %v701_v9, %v2134_v0  ;;  %v713_v60 = vmul.f32 %v701_v9, %v2137_v1  ;;  %v717_v25 = vmul.f32 %v701_v9, %v2149_v11  ;;  %v715_v62 = vmul.f32 %v701_v9, %v2141_v7 }
 0x149   : > { %v749_v8 = vpop.permute.xlu2 %748 }
 0x151   : > { %v754_v23 = vpop.permute.xlu2 %753 }
 0x160   : > { %v731_v12 = vpop.permute.xlu1 %730 }
 0x161   : > { %v721_v13 = vpop.permute.xlu0 %720  ;;  %v742_v1 = vmul.f32 %v731_v12, %v714_v22  ;;  %v743_v29 = vmul.f32 %v731_v12, %v715_v62 }
 0x162   : > { %v738_v14 = vmul.f32 %v721_v13, %v710_v6  ;;  %v739_v15 = vmul.f32 %v721_v13, %v711_v5 }
 0x164   : > { %v766_v16 = vadd.f32 %v749_v8, %v738_v14  ;;  %v767_v17 = vadd.f32 %v749_v8, %v739_v15 }
 0x166   : > { %774 = vst [vmem:[%s2190_s25] sm:$0xff] %v766_v16 }
 0x167   : > { %775 = vst [vmem:[%s2190_s25 + $0x8] sm:$0xff] %v767_v17 }
 0x168   : > { %v736_v0 = vpop.permute.xlu1 %735 }
 0x169   : > { %v726_v19 = vpop.permute.xlu0 %725  ;;  %v744_v28 = vmul.f32 %v736_v0, %v716_v24  ;;  %v745_v2 = vmul.f32 %v736_v0, %v717_v25 }
 0x16a   : > { %v740_v20 = vmul.f32 %v726_v19, %v712_v18  ;;  %v741_v21 = vmul.f32 %v726_v19, %v713_v60 }
 0x16c   : > { %v768_v26 = vadd.f32 %v754_v23, %v740_v20  ;;  %v769_v27 = vadd.f32 %v754_v23, %v741_v21 }
 0x16e   : > { %776 = vst [vmem:[%s2190_s25 + $0x10] sm:$0xff] %v768_v26 }
 0x16f   : > { %777 = vst [vmem:[%s2190_s25 + $0x18] sm:$0xff] %v769_v27 }
 0x170   : > { %v764_v30 = vpop.permute.xlu1 %763 }
 0x171   : > { %v759_v10 = vpop.permute.xlu0 %758  ;;  %v772_v31 = vadd.f32 %v764_v30, %v744_v28  ;;  %v773_v11 = vadd.f32 %v764_v30, %v745_v2 }
 0x172   : > { %v770_v32 = vadd.f32 %v759_v10, %v742_v1  ;;  %v771_v33 = vadd.f32 %v759_v10, %v743_v29  ;;  %864 = sbr.rel (!%p1769_p9) target bundleno = 407 (0x197), region = 110 }
 0x173   : > { %780 = vst [vmem:[%s2190_s25 + $0x30] sm:$0xff] %v772_v31 }
 0x174   : > { %781 = vst [vmem:[%s2190_s25 + $0x38] sm:$0xff] %v773_v11 }
 0x175   : > { %778 = vst [vmem:[%s2190_s25 + $0x20] sm:$0xff] %v770_v32 }
 0x176   : > { %779 = vst [vmem:[%s2190_s25 + $0x28] sm:$0xff] %v771_v33 }
 0x177   : > { %s2381_s11 = smov (!%p867_p6, %s866_s11), 2 }
 0x178   : > { %s1153_s17 = sshll.u32 %s2381_s11, 5 }
 0x179   : > { %s870_s15 = ssub.s32 64, %s1153_s17 }
 0x17a   : > { %s871_s9 = sshll.u32 %s870_s15, 4 }
 0x17b   : > { %872 = vsyncadd %s853_s16, %s871_s9  ;;  %p2216_p12 = scmp.ne.s32.totalorder %s1153_s17, 0  ;;  %s1171_s27 = sshll.u32 %s1742_s22, 4 }
 0x17c   : > { %s875_s10 = scalar_lea.hbm %s2325_s4, %s1171_s27  ;;  %s1156_s1 = sshll.u32 %s2381_s11, 3 }
 0x17d   : > { %s878_s20 = sshll.u32 %s2190_s25, 4  ;;  %s880_s7 = sshll.u32 %s875_s10, 4  ;;  %s2226_s20 = int_to_ptr.vmem [resolvable:$true] %s878_s20  ;;  %s2228_s7 = int_to_ptr.hbm [resolvable:$true] %s880_s7 }
 0x17e   : > { %s1173_s23 = sshll.u32 %s2381_s11, 9  ;;  %s1427_s0 = sshra.s32 %s2226_s20, 4  ;;  %s1428_s0 = int_to_ptr.vmem [resolvable:$true] %s1427_s0 }
 0x17f   : > { %s1429_s13 = sshrl.u32 %s1173_s23, 4  ;;  %s1685_s15 = smov [#allocation6]  }
 0x180   : > { %s1434_s17 = scalar_lea.vmem %s1428_s0, %s1429_s13  ;;  %s1438_s9 = scalar_lea.vmem %s1685_s15, 128 }
 0x181   : > { %p1435_p0 = scmp.ne.s32.totalorder %s1428_s0, %s1434_s17  ;;  %p1440_p5 = scmp.lt.s32.totalorder %s1438_s9, %s1434_s17 }
 0x183   : > { %p1436_p1 = pnand %p1435_p0, %p2216_p12 }
 0x185   : > { %p1437_p10 = pneg %p1436_p1 }
 0x187   : > { %p1442_p11 = pnand %p1440_p5, %p1437_p10 }
 0x189   : > { %1445 = shalt.err (!%p1442_p11)
}
 0x18a   : > { %s1446_s25 = sshra.s32 %s2228_s7, 4  ;;  %s1457_s10 = scalar_lea.hbm %s2325_s4, 96  ;;  %s1447_s25 = int_to_ptr.hbm [resolvable:$true] %s1446_s25 }
 0x18b   : > { %s1453_s27 = scalar_lea.hbm %s1447_s25, %s1429_s13  ;;  %p1458_p4 = scmp.lt.s32.totalorder %s1447_s25, %s2325_s4 }
 0x18c   : > { %p1454_p13 = scmp.ne.s32.totalorder %s1447_s25, %s1453_s27  ;;  %p1459_p7 = scmp.lt.s32.totalorder %s1457_s10, %s1453_s27 }
 0x18e   : > { %p1455_p2 = pnand %p1454_p13, %p2216_p12  ;;  %p1460_p8 = por %p1459_p7, %p1458_p4 }
 0x190   : > { %p1456_p3 = pneg %p1455_p2 }
 0x192   : > { %p1461_p6 = pnand %p1460_p8, %p1456_p3 }
 0x194   : > { %1464 = shalt.err (!%p1461_p6)
}
 0x195   : > { %s1686_s17 = smov 256   ;;  %s1687_s13 = smov 384  }
 0x196   : > { %886 = dma.vmem_to_hbm [thread:$0]  (%p2216_p12), %s2226_s20, %s1173_s23, %s2228_s7, %s853_s16, %s1686_s17, %s1687_s13, %s1156_s1  }
 0x197 PF: > { %889 = sbr.rel (!%p1769_p9) target bundleno = 451 (0x1c3), region = 114  ;;  %s1159_s29 = sshll.u32 (%p1769_p9), %s1742_s22, 1 }
 0x198   : > { %s891_s15 = ssub.s32 (%p1769_p9), 3, %s1159_s29  ;;  %s2358_s26 = scalar_lea.sflag (%p1769_p9), [#allocation8], %s2058_s14 }
 0x199   : > { %p892_p0 = scmp.lt.s32.totalorder (%p1769_p9), %s891_s15, 2 }
 0x19c   : > { %s2383_s15 = smov (!%p892_p0, %s891_s15), 2 }
 0x19d   : > { %s894_s9 = smul.u32 12, %s2383_s15 }
 0x19f   : > { %s895_s25 = ssub.s32 24, %s894_s9 }
 0x1a0   : > { %s896_s27 = sshll.u32 %s895_s25, 4 }
 0x1a1   : > { %897 = vsyncadd %s2358_s26, %s896_s27  ;;  %p2263_p12 = scmp.ne.s32.totalorder %s894_s9, 0  ;;  %s1174_s16 = sshll.u32 %s1742_s22, 3 }
 0x1a2   : > { %s900_s20 = scalar_lea.hbm %s2326_s5, %s1174_s16  ;;  %s1162_s7 = sshll.u32 %s2383_s15, 2 }
 0x1a3   : > { %s903_s23 = sshll.u32 %s2179_s28, 4  ;;  %s905_s8 = sshll.u32 %s900_s20, 4  ;;  %s2273_s23 = int_to_ptr.vmem [resolvable:$true] %s903_s23  ;;  %s2275_s8 = int_to_ptr.hbm [resolvable:$true] %s905_s8 }
 0x1a4   : > { %s2278_s12 = smul.u32 192, %s2383_s15  ;;  %s1466_s10 = sshra.s32 %s2273_s23, 4  ;;  %s1467_s10 = int_to_ptr.vmem [resolvable:$true] %s1466_s10 }
 0x1a5   : > { %s1688_s28 = smov [#allocation7]  }
 0x1a6   : > { %s1468_s22 = sshrl.u32 %s2278_s12, 4  ;;  %s1477_s29 = scalar_lea.vmem %s1688_s28, 48 }
 0x1a7   : > { %s1504_s0 = sshll.u32 %s1468_s22, 4  ;;  %s1471_s17 = sadd.s32 1, %s1468_s22 }
 0x1a8   : > { %p1470_p9 = scmp.ne.s32.totalorder %s1504_s0, %s2278_s12 }
 0x1aa   : > { %s2385_s17 = smov (!%p1470_p9, %s1471_s17), %s1468_s22 }
 0x1ab   : > { %s1473_s13 = scalar_lea.vmem %s1467_s10, %s2385_s17 }
 0x1ac   : > { %p1474_p1 = scmp.ne.s32.totalorder %s1467_s10, %s1473_s13  ;;  %p1479_p11 = scmp.lt.s32.totalorder %s1477_s29, %s1473_s13 }
 0x1ae   : > { %p1475_p10 = pnand %p1474_p1, %p2263_p12 }
 0x1b0   : > { %p1476_p5 = pneg %p1475_p10 }
 0x1b2   : > { %p1481_p13 = pnand %p1479_p11, %p1476_p5 }
 0x1b4   : > { %1484 = shalt.err (!%p1481_p13)
}
 0x1b5   : > { %s1485_s9 = sshra.s32 %s2275_s8, 4  ;;  %s1496_s16 = scalar_lea.hbm %s2326_s5, 36  ;;  %s1486_s9 = int_to_ptr.hbm [resolvable:$true] %s1485_s9 }
 0x1b6   : > { %s1492_s25 = scalar_lea.hbm %s1486_s9, %s2385_s17  ;;  %p1497_p7 = scmp.lt.s32.totalorder %s1486_s9, %s2326_s5 }
 0x1b7   : > { %p1493_p2 = scmp.ne.s32.totalorder %s1486_s9, %s1492_s25  ;;  %p1498_p8 = scmp.lt.s32.totalorder %s1496_s16, %s1492_s25 }
 0x1b9   : > { %p1494_p3 = pnand %p1493_p2, %p2263_p12  ;;  %p1499_p6 = por %p1498_p8, %p1497_p7 }
 0x1bb   : > { %p1495_p4 = pneg %p1494_p3 }
 0x1bd   : > { %p1500_p0 = pnand %p1499_p6, %p1495_p4 }
 0x1bf   : > { %1503 = shalt.err (!%p1500_p0)
}
 0x1c0   : > { %s1689_s20 = smov 128   ;;  %s1690_s10 = smov 192  }
 0x1c1   : > { %s2360_s22 = scalar_lea.sflag [#allocation8], %s2058_s14 }
 0x1c2   : > { %911 = dma.vmem_to_hbm [thread:$0]  (%p2263_p12), %s2273_s23, %s2278_s12, %s2275_s8, %s2360_s22, %s1689_s20, %s1690_s10, %s1162_s7  }
 0x1c3 PF: > { %s920_s0 = sand.u32 1, %s1599_s18   ;;  %p2361_p9 = scmp.ne.s32.totalorder %s2337_s6, 0 }
 0x1c4   : > { %p2362_p1 = scmp.ge.s32.totalorder %s1611_s21, 2  ;;  %s921_s17 = scalar_lea.sflag [#allocation4], %s920_s0 }
 0x1c6   : > { %p1181_p10 = pnand %p2362_p1, %p2361_p9 }
 0x1c8   : > { %p1182_p5 = pneg %p1181_p10 }
 0x1ca   : > { %1590 = dma.done.wait (%p1182_p5), %s921_s17, 1024  }
 0x1cb   : > { %1592 = vsyncadd (%p1182_p5), %s921_s17, 4294966272  ;;  %s931_s13 = scalar_lea.sflag [#allocation8], %s920_s0 }
 0x1cc   : > { %1594 = dma.done.wait (%p1182_p5), %s931_s13, 384  }
 0x1cd   : > { %1596 = vsyncadd (%p1182_p5), %s931_s13, 4294966912  ;;  %s2363_s14 = sld [smem:[#allocation12_spill]]  ;;  %p22_p12 = scmp.ge.s32.totalorder %s1746_s24, 4  }
 0x1ce   : > { %s2364_s20 = sld [smem:[#allocation13_spill]]  ;;  %s2365_s18 = smov %s1603_s19 }
 0x1cf   : > { %s2367_s21 = smov %s1746_s24  ;;  %24 = sbr.rel (!%p22_p12) target bundleno = 10 (0xa), region = 234 }
 0x1d3   : > { %s2366_s19 = smov %s2363_s14 }
 0x1d4   :  { %937 = vsyncpa [#allocation3], 1 }
 0x1d5   :  { %939 = vsyncpa [#allocation3 + $0x1], 1 }
 0x1d6   :  { %940 = vsyncpa [#allocation4], 1 }
 0x1d7   :  { %942 = vsyncpa [#allocation4 + $0x1], 1 }
 0x1d8   :  { %943 = vsyncpa [#allocation8], 1 }
 0x1d9   :  { %945 = vsyncpa [#allocation8 + $0x1], 1 }

</bundles_post_ra>
